<compile_context>
chip_gen: v5e
topology: v5e:2x2
jax: 0.10.0
libtpu: 0.0.40
codegen_flags: <defaults>
</compile_context>

<pallas_src>
import functools
import math

import jax
import jax.numpy as jnp
from jax.experimental import pallas as pl
from jax.experimental.pallas import tpu as pltpu


def _sinusoidal_ref(x: jax.Array, dim: int) -> jax.Array:
    """Pure-JAX reference, bit-matching the PyTorch module (sin | cos concat)."""
    half = dim // 2
    emb = math.log(10000.0) / (half - 1)
    emb = jnp.exp(jnp.arange(half, dtype=jnp.float32) * -emb)
    emb = x.astype(jnp.float32)[:, None] * emb[None, :]
    return jnp.concatenate([jnp.sin(emb), jnp.cos(emb)], axis=-1)


def _emb_kernel(x_ref, tab_ref, o_ref, *, k: int):
    # x_ref:   (k, TB, 1) f32 — timestep for segment j of each packed output row.
    # tab_ref: (k+1, W) f32 — rows 0..k-1: frequency row for segment j
    #          ([f | f] in lanes [j*dim, (j+1)*dim), zeros elsewhere);
    #          row k: phase row (0 on sin lanes, pi/2 on cos lanes).
    # o_ref:   (TB, W) f32 with W = k*dim (128 when packed, lane-dense).
    arg = x_ref[0] * tab_ref[0:1, :]                    # (TB,1)*(1,W) -> (TB,W), VPU
    for j in range(1, k):                               # static unroll, k <= 8
        arg = arg + x_ref[j] * tab_ref[j:j + 1, :]      # other segments are * 0 (exact)
    # Single full-width, lane-dense store; cos fused as sin(z + pi/2).
    o_ref[...] = jnp.sin(arg + tab_ref[k:k + 1, :])     # EUP/VPU


def sinusoidal_pos_emb(x: jax.Array, dim: int, *, block_rows: int = 8192,
                       allow_jax_fallback: bool = True) -> jax.Array:
    """x: (B,) timesteps -> (B, dim) float32 embedding (PyTorch SinusoidalPosEmb)."""
    assert dim % 2 == 0 and dim >= 4, "dim must be even and >= 4 (half_dim - 1 > 0)"
    B = x.shape[0]

    # Launch-overhead guard: tiny problems are best left to XLA fusion.
    # TODO(synk): at shipped sizes (B ~ 8-256) fusing into the consumer MLP
    # kernel removes the custom-call boundary entirely.
    if allow_jax_fallback and B * dim * 4 < (256 << 10):
        return _sinusoidal_ref(x, dim)

    half = dim // 2
    scale = -math.log(10000.0) / (half - 1)
    freqs = jnp.exp(jnp.arange(half, dtype=jnp.float32) * scale)       # (half,)
    freq_full = jnp.concatenate([freqs, freqs])                        # (dim,)  [f | f]
    phase_full = jnp.concatenate(
        [jnp.zeros((half,), jnp.float32),
         jnp.full((half,), math.pi / 2, dtype=jnp.float32)])           # (dim,)  [0 | pi/2]

    # Lane packing: k timesteps per 128-lane output row when dim divides 128.
    k = 1
    if dim < 128 and 128 % dim == 0:
        kk = 128 // dim
        if kk <= 8 and B % kk == 0:
            k = kk
    W = k * dim
    rows = B // k

    # Resident table: k block-diagonal frequency rows + 1 phase row -> (k+1, W).
    m = (jnp.eye(k, dtype=jnp.float32)[:, :, None]
         * freq_full[None, None, :]).reshape(k, W)
    table = jnp.concatenate([m, jnp.tile(phase_full, k)[None, :]], axis=0)

    # x laid out as (k, rows, 1): segment-j timestep of each packed row,
    # sublane-major so the kernel's (TB,1)*(1,W) broadcast is the standard one.
    x_in = x.astype(jnp.float32).reshape(rows, k).T.reshape(k, rows, 1)

    # Row tiling: biggest block with <= ~4 MiB of output (double-buffered blocks
    # stay well under the 32 MiB scoped-VMEM default -> safe on v7x's 64 MiB/TC),
    # rounded to a multiple of 8 (sublane rule).
    block_rows = max(8, (block_rows // 8) * 8)
    vmem_rows = max(8, (((4 << 20) // (W * 4)) // 8) * 8)
    tb = min(block_rows, vmem_rows)
    if rows <= tb:
        if rows >= 2048:
            # Keep >= 2 grid steps so both v7x TensorCores get work.
            tb = ((-(-rows // 2)) + 7) // 8 * 8
        else:
            tb = rows                     # single full-extent block
    grid = (pl.cdiv(rows, tb),)           # ragged last block: no pad, no out[:B] copy

    out = pl.pallas_call(
        functools.partial(_emb_kernel, k=k),
        out_shape=jax.ShapeDtypeStruct((rows, W), jnp.float32),
        grid=grid,
        in_specs=[
            pl.BlockSpec((k, tb, 1), lambda i: (0, i, 0)),     # timesteps tile
            pl.BlockSpec((k + 1, W), lambda i: (0, 0)),        # resident freq/phase table
        ],
        out_specs=pl.BlockSpec((tb, W), lambda i: (i, 0)),
        compiler_params=pltpu.CompilerParams(
            dimension_semantics=("parallel",),                 # shard rows over v7x's 2 TCs
        ),
        cost_estimate=pl.CostEstimate(
            flops=2 * B * dim,                                 # freq mul + phase add
            transcendentals=B * dim,                           # one sin per element
            bytes_accessed=B * dim * 4 + B * 4 + (k + 1) * W * 4,
        ),
    )(x_in, table)

    # (rows, k*dim) row-major is exactly (B, dim) row-major: free view.
    return out.reshape(B, dim)


if __name__ == "__main__":
    key = jax.random.PRNGKey(0)
    # cos is computed as sin(z + pi/2); at |z| ~ 1e3 the f32 rounding of the
    # shifted argument gives up to ~1e-4 abs difference vs jnp.cos.
    TOL = 5e-4

    # Case 1: module-consistent small batch of diffusion timesteps
    # (dim=32 -> packed path, 4 timesteps per 128-lane row, single block).
    B, dim = 8, 32
    x = jax.random.uniform(key, (B,), dtype=jnp.float32, minval=0.0, maxval=1000.0)
    out = jax.block_until_ready(sinusoidal_pos_emb(x, dim, allow_jax_fallback=False))
    ref = _sinusoidal_ref(x, dim)
    assert out.shape == (B, dim)
    assert jnp.allclose(out, ref, atol=TOL, rtol=0.0), "mismatch vs reference (small/packed)"

    # Case 2: ragged multi-block grid on the packed path (625 rows, tb=256).
    B2 = 2500
    x2 = jax.random.uniform(jax.random.PRNGKey(1), (B2,), dtype=jnp.float32,
                            minval=0.0, maxval=1000.0)
    out2 = jax.block_until_ready(
        sinusoidal_pos_emb(x2, 32, block_rows=256, allow_jax_fallback=False))
    assert out2.shape == (B2, 32)
    assert jnp.allclose(out2, _sinusoidal_ref(x2, 32), atol=TOL, rtol=0.0), \
        "mismatch vs reference (grid/packed)"

    # Case 3: dim that does not divide 128 -> un-packed layout, ragged grid.
    B3, dim3 = 300, 40
    x3 = jax.random.uniform(jax.random.PRNGKey(2), (B3,), dtype=jnp.float32,
                            minval=0.0, maxval=1000.0)
    out3 = jax.block_until_ready(
        sinusoidal_pos_emb(x3, dim3, block_rows=64, allow_jax_fallback=False))
    assert out3.shape == (B3, dim3)
    assert jnp.allclose(out3, _sinusoidal_ref(x3, dim3), atol=TOL, rtol=0.0), \
        "mismatch vs reference (unpacked/ragged)"

    print("KERNEL_OK")
</pallas_src>

<mosaic_0001>
module attributes {stable_mosaic.version = 11 : i64} {
  func.func @_emb_kernel(%arg0: i32, %arg1: memref<4x2x1xf32, #tpu.memory_space<vmem>>, %arg2: memref<5x128xf32, #tpu.memory_space<vmem>>, %arg3: memref<2x128xf32, #tpu.memory_space<vmem>>) attributes {dimension_semantics = [#tpu.dimension_semantics<parallel>], iteration_bounds = array<i64: 1>, scalar_prefetch = 0 : i64, scratch_operands = 0 : i64, tpu.core_type = #tpu.core_type<tc>, window_params = [{transform_indices = @transform_0, window_bounds = array<i64: 4, 2, 1>}, {pipeline_mode = #tpu.pipeline_mode<synchronous>, transform_indices = @transform_1, window_bounds = array<i64: 5, 128>}, {transform_indices = @transform_2, window_bounds = array<i64: 2, 128>}]} {
    %c0 = arith.constant 0 : index
    %c0_0 = arith.constant 0 : index
    %c0_1 = arith.constant 0 : index
    %0 = vector.load %arg1[%c0, %c0_0, %c0_1] : memref<4x2x1xf32, #tpu.memory_space<vmem>>, vector<1x2x1xf32>
    %1 = vector.shape_cast %0 : vector<1x2x1xf32> to vector<2x1xf32>
    %c0_2 = arith.constant 0 : index
    %c0_3 = arith.constant 0 : index
    %2 = vector.load %arg2[%c0_2, %c0_3] : memref<5x128xf32, #tpu.memory_space<vmem>>, vector<1x128xf32>
    %3 = vector.broadcast %1 : vector<2x1xf32> to vector<2x128xf32>
    %4 = vector.broadcast %2 : vector<1x128xf32> to vector<2x128xf32>
    %5 = arith.mulf %3, %4 : vector<2x128xf32>
    %c1 = arith.constant 1 : index
    %c0_4 = arith.constant 0 : index
    %c0_5 = arith.constant 0 : index
    %6 = vector.load %arg1[%c1, %c0_4, %c0_5] : memref<4x2x1xf32, #tpu.memory_space<vmem>>, vector<1x2x1xf32>
    %7 = vector.shape_cast %6 : vector<1x2x1xf32> to vector<2x1xf32>
    %c1_6 = arith.constant 1 : index
    %c0_7 = arith.constant 0 : index
    %8 = vector.load %arg2[%c1_6, %c0_7] : memref<5x128xf32, #tpu.memory_space<vmem>>, vector<1x128xf32>
    %9 = vector.broadcast %7 : vector<2x1xf32> to vector<2x128xf32>
    %10 = vector.broadcast %8 : vector<1x128xf32> to vector<2x128xf32>
    %11 = arith.mulf %9, %10 : vector<2x128xf32>
    %12 = arith.addf %5, %11 : vector<2x128xf32>
    %c2 = arith.constant 2 : index
    %c0_8 = arith.constant 0 : index
    %c0_9 = arith.constant 0 : index
    %13 = vector.load %arg1[%c2, %c0_8, %c0_9] : memref<4x2x1xf32, #tpu.memory_space<vmem>>, vector<1x2x1xf32>
    %14 = vector.shape_cast %13 : vector<1x2x1xf32> to vector<2x1xf32>
    %c2_10 = arith.constant 2 : index
    %c0_11 = arith.constant 0 : index
    %15 = vector.load %arg2[%c2_10, %c0_11] : memref<5x128xf32, #tpu.memory_space<vmem>>, vector<1x128xf32>
    %16 = vector.broadcast %14 : vector<2x1xf32> to vector<2x128xf32>
    %17 = vector.broadcast %15 : vector<1x128xf32> to vector<2x128xf32>
    %18 = arith.mulf %16, %17 : vector<2x128xf32>
    %19 = arith.addf %12, %18 : vector<2x128xf32>
    %c3 = arith.constant 3 : index
    %c0_12 = arith.constant 0 : index
    %c0_13 = arith.constant 0 : index
    %20 = vector.load %arg1[%c3, %c0_12, %c0_13] : memref<4x2x1xf32, #tpu.memory_space<vmem>>, vector<1x2x1xf32>
    %21 = vector.shape_cast %20 : vector<1x2x1xf32> to vector<2x1xf32>
    %c3_14 = arith.constant 3 : index
    %c0_15 = arith.constant 0 : index
    %22 = vector.load %arg2[%c3_14, %c0_15] : memref<5x128xf32, #tpu.memory_space<vmem>>, vector<1x128xf32>
    %23 = vector.broadcast %21 : vector<2x1xf32> to vector<2x128xf32>
    %24 = vector.broadcast %22 : vector<1x128xf32> to vector<2x128xf32>
    %25 = arith.mulf %23, %24 : vector<2x128xf32>
    %26 = arith.addf %19, %25 : vector<2x128xf32>
    %c4 = arith.constant 4 : index
    %c0_16 = arith.constant 0 : index
    %27 = vector.load %arg2[%c4, %c0_16] : memref<5x128xf32, #tpu.memory_space<vmem>>, vector<1x128xf32>
    %28 = vector.broadcast %27 : vector<1x128xf32> to vector<2x128xf32>
    %29 = arith.addf %26, %28 : vector<2x128xf32>
    %30 = math.sin %29 : vector<2x128xf32>
    %c0_17 = arith.constant 0 : index
    %c0_18 = arith.constant 0 : index
    %31 = vector.load %arg3[%c0_17, %c0_18] : memref<2x128xf32, #tpu.memory_space<vmem>>, vector<2x128xf32>
    tpu.vector_store %arg3[%c0_17, %c0_18], %30 {strides = array<i32>} : memref<2x128xf32, #tpu.memory_space<vmem>>, vector<2x128xf32>,
    return
  }
  func.func @transform_0(%arg0: i32) -> (i32, i32, i32) {
    %c0_i32 = arith.constant 0 : i32
    %c0_i32_0 = arith.constant 0 : i32
    %c0_i32_1 = arith.constant 0 : i32
    return %c0_i32, %arg0, %c0_i32_0 : i32, i32, i32
  }
  func.func @transform_1(%arg0: i32) -> (i32, i32) {
    %c0_i32 = arith.constant 0 : i32
    %c0_i32_0 = arith.constant 0 : i32
    %c0_i32_1 = arith.constant 0 : i32
    return %c0_i32, %c0_i32_0 : i32, i32
  }
  func.func @transform_2(%arg0: i32) -> (i32, i32) {
    %c0_i32 = arith.constant 0 : i32
    %c0_i32_0 = arith.constant 0 : i32
    return %arg0, %c0_i32 : i32, i32
  }
}

</mosaic_0001>

<bundles_post_ra>
// kernel: tpu_custom_call.1
= control target key start
LH: loop header
LB: loop body
LE: loop exit
PB: predicated region body
PF: predicated region fallthrough
CT: control target
= control target key end

     0   :  { %v276_v2 = vmov 0   ;;  %s391_s0 = inlined_call_operand.vmem [shape: f32[4,2,1], index: 0, kind: input, shape index: {}]   ;;  %s392_s1 = inlined_call_operand.vmem [shape: f32[5,128], index: 1, kind: input, shape index: {}]   ;;  %s393_s2 = inlined_call_operand.hbm [shape: f32[2,128], index: 2, kind: output, shape index: {}]  }
   0x1   :  { %v230_v0 = vld [vmem:[%s391_s0 + $0x4] sm:$0x3]  ;;  %v12_v1 = vld [vmem:[%s391_s0] sm:$0x3]  ;;  %244 = vset.pattern.permute.xlu1 %v276_v2  ;;  %243 = vset.pattern.permute.xlu0 %v276_v2 }
   0x2   :  { %37 = vperm.xlu1 %244, %v230_v0   ;;  %16 = vperm.xlu0 %243, %v12_v1  }
   0x3   :  { %7 = vsyncpa [#allocation3], 0  ;;  %v231_v3 = vld [vmem:[%s391_s0 + $0x6] sm:$0x3]  ;;  %v229_v4 = vld [vmem:[%s391_s0 + $0x2] sm:$0x3] }
   0x4   :  { %v246_v7 = vld [vmem:[%s392_s1] ss:$0 sm:$0xff]  ;;  %v248_v8 = vld [vmem:[%s392_s1 + $0x1] ss:$0 sm:$0xff]  ;;  %v245_v9 = vld [vmem:[%s392_s1 + $0x2] ss:$0 sm:$0xff] }
   0x5   :  { %v247_v12 = vld [vmem:[%s392_s1 + $0x3] ss:$0 sm:$0xff]  ;;  %v249_v18 = vld [vmem:[%s392_s1 + $0x4] ss:$0 sm:$0xff]  ;;  %v277_v33 = vmov 683565275  }
   0x6   :  { %v278_v35 = vmov 2475754826   ;;  %v279_v38 = vmov 2131351028   ;;  %v280_v41 = vmov 2102212464  }
   0x7   :  { %v281_v44 = vmov 920167782   ;;  %v282_v47 = vmov 1326507024   ;;  %s283_s1 = smov [#allocation2]   ;;  %s220_s29 = sshll.u32 %s393_s2, 4  ;;  %s221_s29 = int_to_ptr.hbm [resolvable:$true] %s220_s29 }
   0x8   :  { %s218_s26 = sshll.u32 %s283_s1, 4  ;;  %s219_s26 = int_to_ptr.vmem [resolvable:$true] %s218_s26 }
   0xa   :  { %48 = vperm.xlu1 %244, %v231_v3   ;;  %26 = vperm.xlu0 %243, %v229_v4  }
  0x74   :  { %v38_v5 = vpop.permute.xlu1 %37  ;;  %v17_v6 = vpop.permute.xlu0 %16 }
  0x75   :  { %v20_v11 = vmul.f32 %v246_v7, %v17_v6  ;;  %v41_v15 = vmul.f32 %v245_v9, %v38_v5 }
  0x7c   :  { %v27_v10 = vpop.permute.xlu0 %26  ;;  %v49_v14 = vpop.permute.xlu1 %48 }
  0x7d   :  { %v30_v13 = vmul.f32 %v248_v8, %v27_v10  ;;  %v52_v17 = vmul.f32 %v247_v12, %v49_v14 }
  0x7f   :  { %v31_v16 = vadd.f32 %v30_v13, %v20_v11 }
  0x81   :  { %v42_v19 = vadd.f32 %v41_v15, %v31_v16 }
  0x83   :  { %v53_v20 = vadd.f32 %v52_v17, %v42_v19 }
  0x85   :  { %v328_v21 = vadd.f32 %v249_v18, %v53_v20 }
  0x87   :  { %v60_v22 = vand.u32 2139095040, %v328_v21  ;;  %v57_v25 = vand.u32 2147483647, %v328_v21  ;;  %vm59_vm12 = vcmp.lt.s32.totalorder %v328_v21, 0 }
  0x89   :  { %v61_v23 = vshrl.u32 %v60_v22, 23  ;;  %v64_v28 = vand.u32 8388607, %v57_v25  ;;  %vm58_vm13 = vcmp.le.f32.partialorder %v57_v25, 0.7853982 }
  0x8b   :  { %v232_v24 = vadd.s32 4294967169, %v61_v23  ;;  %v65_v32 = vor.u32 8388608, %v64_v28 }
  0x8d   :  { %v67_v26 = vadd.s32 1, %v232_v24  ;;  %v345_v54 = vshll.u32 %v65_v32, 8 }
  0x8f   :  { %vm68_vm0 = vcmp.gt.s32.totalorder %v67_v26, 0  ;;  %v106_v63 = vand.u32 65535, %v345_v54  ;;  %v107_v0 = vshrl.u32 %v345_v54, 16 }
  0x90   :  { %v69_v27 = vsel %vm68_vm0, %v67_v26, 0 }
  0x91   :  { %v71_v29 = vand.u32 31, %v69_v27  ;;  %v336_v31 = vshrl.u32 %v69_v27, 5 }
  0x93   :  { %v334_v30 = vsub.s32 32, %v71_v29  ;;  %v74_v34 = vshll.u32 %v277_v33, %v71_v29  ;;  %v77_v36 = vshll.u32 %v278_v35, %v71_v29  ;;  %v80_v40 = vshll.u32 %v279_v38, %v71_v29 }
  0x94   :  { %v83_v43 = vshll.u32 %v280_v41, %v71_v29  ;;  %v86_v46 = vshll.u32 %v281_v44, %v71_v29  ;;  %vm89_vm1 = vcmp.lt.s32.totalorder %v336_v31, 1  ;;  %vm92_vm2 = vcmp.lt.s32.totalorder %v336_v31, 4 }
  0x95   :  { %v75_v37 = vshrl.u32 %v278_v35, %v334_v30  ;;  %v78_v39 = vshrl.u32 %v279_v38, %v334_v30  ;;  %v81_v42 = vshrl.u32 %v280_v41, %v334_v30  ;;  %v84_v45 = vshrl.u32 %v281_v44, %v334_v30 }
  0x96   :  { %v87_v48 = vshrl.u32 %v282_v47, %v334_v30  ;;  %vm91_vm3 = vcmp.lt.s32.totalorder %v336_v31, 3  ;;  %vm90_vm4 = vcmp.lt.s32.totalorder %v336_v31, 2  ;;  %v73_v28 = vshrl.u32 %v277_v33, %v334_v30 }
  0x97   :  { %v76_v49 = vor.u32 %v75_v37, %v74_v34  ;;  %v79_v50 = vor.u32 %v78_v39, %v77_v36  ;;  %v82_v51 = vor.u32 %v81_v42, %v80_v40  ;;  %v85_v52 = vor.u32 %v84_v45, %v83_v43 }
  0x98   :  { %v88_v53 = vor.u32 %v87_v48, %v86_v46 }
  0x99   :  { %v97_v55 = vsel %vm89_vm1, %v76_v49, %v79_v50  ;;  %v101_v56 = vsel %vm89_vm1, %v79_v50, %v82_v51  ;;  %v98_v57 = vsel %vm92_vm2, %v85_v52, 920167782  ;;  %v94_v24 = vsel %vm92_vm2, %v82_v51, 2102212464 }
  0x9a   :  { %v102_v58 = vsel %vm92_vm2, %v88_v53, 1326507024  ;;  %v99_v59 = vsel %vm91_vm3, %v82_v51, %v98_v57  ;;  %v93_v37 = vsel %vm89_vm1, %v73_v28, %v76_v49  ;;  %v95_v38 = vsel %vm91_vm3, %v79_v50, %v94_v24 }
  0x9b   :  { %v103_v60 = vsel %vm91_vm3, %v85_v52, %v102_v58  ;;  %v100_v61 = vsel %vm90_vm4, %v97_v55, %v99_v59  ;;  %v96_v30 = vsel %vm90_vm4, %v93_v37, %v95_v38  ;;  %vm200_vm1 = vweird.f32 %v328_v21 }
  0x9c   :  { %v104_v62 = vsel %vm90_vm4, %v101_v56, %v103_v60  ;;  %v130_v4 = vand.u32 65535, %v100_v61  ;;  %v131_v5 = vshrl.u32 %v100_v61, 16  ;;  %v150_v45 = vmul.u32 %v345_v54, %v96_v30 }
  0x9d   :  { %v108_v1 = vand.u32 65535, %v104_v62  ;;  %v109_v3 = vshrl.u32 %v104_v62, 16 }
  0x9e   :  { %v133_v8 = vmul.u32 %v131_v5, %v106_v63  ;;  %v134_v9 = vmul.u32 %v130_v4, %v107_v0  ;;  %v132_v13 = vmul.u32 %v130_v4, %v106_v63  ;;  %v135_v17 = vmul.u32 %v131_v5, %v107_v0 }
  0x9f   :  { %v111_v6 = vmul.u32 %v109_v3, %v106_v63  ;;  %v112_v7 = vmul.u32 %v108_v1, %v107_v0  ;;  %v110_v10 = vmul.u32 %v108_v1, %v106_v63  ;;  %v113_v12 = vmul.u32 %v109_v3, %v107_v0 }
  0xa0   :  { %v136_v14 = vshll.u32 %v133_v8, 16  ;;  %v138_v19 = vshll.u32 %v134_v9, 16  ;;  %v137_v35 = vshrl.u32 %v133_v8, 16  ;;  %v139_v41 = vshrl.u32 %v134_v9, 16 }
  0xa1   :  { %v114_v11 = vshll.u32 %v111_v6, 16  ;;  %v116_v15 = vshll.u32 %v112_v7, 16  ;;  %v115_v29 = vshrl.u32 %v111_v6, 16  ;;  %v117_v39 = vshrl.u32 %v112_v7, 16 }
  0xa2   :  { %vm140_vm6 = vc.u32 %v132_v13, %v136_v14  ;;  %v142_v20 = vadd.s32 %v136_v14, %v132_v13 }
  0xa3   :  { %vm118_vm5 = vc.u32 %v110_v10, %v114_v11  ;;  %v120_v16 = vadd.s32 %v114_v11, %v110_v10  ;;  %v141_v23 = vsel %vm140_vm6, 1, %v276_v2 }
  0xa4   :  { %v119_v18 = vsel %vm118_vm5, 1, %v276_v2  ;;  %v143_v27 = vadd.s32 %v141_v23, %v135_v17  ;;  %vm144_vm8 = vc.u32 %v142_v20, %v138_v19  ;;  %v146_v44 = vadd.s32 %v142_v20, %v138_v19 }
  0xa5   :  { %v121_v22 = vadd.s32 %v119_v18, %v113_v12  ;;  %vm122_vm7 = vc.u32 %v120_v16, %v116_v15  ;;  %v145_v34 = vsel %vm144_vm8, 1, %v276_v2 }
  0xa6   :  { %v123_v26 = vsel %vm122_vm7, 1, %v276_v2  ;;  %v147_v36 = vadd.s32 %v145_v34, %v143_v27 }
  0xa7   :  { %v125_v32 = vadd.s32 %v123_v26, %v121_v22 }
  0xa8   :  { %v148_v42 = vadd.s32 %v147_v36, %v137_v35 }
  0xa9   :  { %v126_v40 = vadd.s32 %v125_v32, %v115_v29 }
  0xaa   :  { %v149_v33 = vadd.s32 %v148_v42, %v139_v41 }
  0xab   :  { %v127_v43 = vadd.s32 %v126_v40, %v117_v39 }
  0xac   :  { %v153_v2 = vadd.s32 1, %v149_v33 }
  0xad   :  { %vm152_vm9 = vc.u32 %v127_v43, %v146_v44  ;;  %v151_v31 = vadd.s32 %v146_v44, %v127_v43 }
  0xae   :  { %v154_v46 = vsel %vm152_vm9, %v153_v2, %v149_v33 }
  0xaf   :  { %v155_v47 = vadd.s32 %v154_v46, %v150_v45 }
  0xb1   :  { %v156_v48 = vadd.s32 536870912, %v155_v47 }
  0xb3   :  { %v157_v49 = vshrl.u32 %v156_v48, 30 }
  0xb5   :  { %v158_v51 = vshll.u32 %v157_v49, 30  ;;  %v181_v7 = vsub.s32 4, %v157_v49 }
  0xb7   :  { %v159_v50 = vsub.s32 %v155_v47, %v158_v51  ;;  %v182_v12 = vsel %vm59_vm12, %v181_v7, %v157_v49 }
  0xb8   :  { %v184_v15 = vsel %vm58_vm13, 0, %v182_v12 }
  0xb9   :  { %vm160_vm10 = vcmp.lt.s32.totalorder %v159_v50, 0  ;;  %v161_v52 = vsub.s32 0, %v159_v50  ;;  %v201_v20 = vadd.s32 3, %v184_v15 }
  0xbb   :  { %v162_v53 = vsel %vm160_vm10, %v161_v52, %v159_v50  ;;  %v202_v26 = vand.u32 3, %v201_v20 }
  0xbc   :  { %v163_v55 = vclz %v162_v53 }
  0xbd   :  { %vm204_vm14 = vcmp.eq.s32.totalorder %v202_v26, 0  ;;  %vm207_vm15 = vcmp.eq.s32.totalorder %v202_v26, 2  ;;  %vm203_vm0 = vcmp.lt.s32.totalorder %v202_v26, 2 }
  0xbe   :  { %v233_v56 = vadd.s32 4294967294, %v163_v55 }
  0xc0   :  { %vm234_vm11 = vcmp.lt.s32.totalorder %v233_v56, 0 }
  0xc1   :  { %v166_v57 = vsel %vm234_vm11, 0, %v233_v56 }
  0xc2   :  { %v167_v58 = vsub.s32 32, %v166_v57  ;;  %v171_v59 = vsub.s32 4294967266, %v166_v57  ;;  %v168_v60 = vshll.u32 %v159_v50, %v166_v57 }
  0xc4   :  { %v169_v61 = vshrl.u32 %v151_v31, %v167_v58  ;;  %v172_v62 = vadd.s32 127, %v171_v59 }
  0xc6   :  { %v170_v54 = vor.u32 %v169_v61, %v168_v60  ;;  %v173_v63 = vshll.u32 %v172_v62, 23 }
  0xc8   :  { %v174_v0 = vor.u32 4788187, %v173_v63  ;;  %v177_v3 = vcvt.s32.f32 %v170_v54 }
  0xca   :  { %v175_v1 = vand.u32 2147483647, %v174_v0 }
  0xcc   :  { %v178_v4 = vmul.f32 %v177_v3, %v175_v1 }
  0xce   :  { %v179_v5 = vxor.u32 2147483648, %v178_v4 }
  0xd0   :  { %v180_v6 = vsel %vm59_vm12, %v179_v5, %v178_v4 }
  0xd1   :  { %v183_v8 = vsel %vm58_vm13, %v328_v21, %v180_v6 }
  0xd2   :  { %v185_v9 = vmul.f32 %v183_v8, %v183_v8 }
  0xd4   :  { %v186_v10 = vmul.f32 -0.001358992, %v185_v9  ;;  %v193_v11 = vmul.f32 -0.00019511016, %v185_v9 }
  0xd6   :  { %v187_v13 = vadd.f32 0.041655596, %v186_v10  ;;  %v194_v14 = vadd.f32 0.008332121, %v193_v11 }
  0xd8   :  { %v188_v16 = vmul.f32 %v187_v13, %v185_v9  ;;  %v195_v17 = vmul.f32 %v194_v14, %v185_v9 }
  0xda   :  { %v189_v18 = vadd.f32 -0.4999988, %v188_v16  ;;  %v196_v19 = vadd.f32 -0.16666654, %v195_v17 }
  0xdc   :  { %v190_v22 = vmul.f32 %v189_v18, %v185_v9  ;;  %v197_v23 = vmul.f32 %v196_v19, %v185_v9 }
  0xde   :  { %v191_v24 = vadd.f32 1.0, %v190_v22  ;;  %v198_v25 = vadd.f32 1.0, %v197_v23 }
  0xe0   :  { %v199_v27 = vmul.f32 %v198_v25, %v183_v8  ;;  %v208_v28 = vxor.u32 2147483648, %v191_v24 }
  0xe2   :  { %v205_v29 = vxor.u32 2147483648, %v199_v27  ;;  %v209_v34 = vsel %vm207_vm15, %v208_v28, %v199_v27 }
  0xe4   :  { %v206_v32 = vsel %vm204_vm14, %v191_v24, %v205_v29 }
  0xe5   :  { %v210_v35 = vsel %vm203_vm0, %v206_v32, %v209_v34 }
  0xe6   :  { %v211_v36 = vsel %vm200_vm1, nan, %v210_v35 }
  0xe7   :  { %212 = vst [vmem:[#allocation2] sm:$0x3] %v211_v36 }
  0xe8   :  { %223 = dma.vmem_to_hbm [thread:$0]  %s219_s26, 32, %s221_s29, [#allocation3]  }
  0xe9   :  { %274 = dma.done.wait [#allocation3], 32  }
  0xea   :  { %275 = vsyncadd [#allocation3], 4294967264 }
  0xeb   :  { %228 = vsyncpa [#allocation3], 1 }

</bundles_post_ra>
